<compile_context>
chip_gen: v7x
topology: tpu7x:2x2x1
jax: 0.10.0
libtpu: 0.0.40
codegen_flags: <defaults>
</compile_context>

<pallas_src>
import functools

import jax
import jax.numpy as jnp
from jax.experimental import pallas as pl
from jax.experimental.pallas import tpu as pltpu

VMEM_LIMIT = 64 * 1024 * 1024  # bytes; > v5e default scoped 16 MiB, <= v7x physical


def _round_up(x, m):
    return (x + m - 1) // m * m


# ----------------------------------------------------------------------------
# In-kernel helpers
# ----------------------------------------------------------------------------
def _layernorm(x, w, b, eps):
    # PyTorch nn.LayerNorm: biased variance, eps inside sqrt, affine. f32 math.
    mu = jnp.mean(x, axis=-1, keepdims=True)
    var = jnp.mean((x - mu) * (x - mu), axis=-1, keepdims=True)
    return (x - mu) * jax.lax.rsqrt(var + eps) * w + b


def _erf(x):
    # Abramowitz & Stegun 7.1.26 polynomial (|abs err| < 1.5e-7 ~ f32 eps).
    a1, a2, a3, a4, a5 = 0.254829592, -0.284496736, 1.421413741, -1.453152027, 1.061405429
    p = 0.3275911
    ax = jnp.abs(x)
    t = 1.0 / (1.0 + p * ax)
    poly = ((((a5 * t + a4) * t + a3) * t + a2) * t + a1) * t
    y = 1.0 - poly * jnp.exp(-ax * ax)
    return jnp.where(x >= 0.0, y, -y)


def _gelu_exact(x):
    # nn.GELU() default = exact (erf-based) GELU.
    return 0.5 * x * (1.0 + _erf(x * 0.7071067811865476))


def _mxu(a, b, dims=(((1,), (0,)), ((), ()))):
    # bf16 operands, f32 accumulation: native MXU path on v5e/v6e/v7x.
    return jax.lax.dot_general(
        a.astype(jnp.bfloat16), b.astype(jnp.bfloat16), dims,
        preferred_element_type=jnp.float32)


# ----------------------------------------------------------------------------
# Kernel 1: patch embedding (Conv2d k=stride=patch == im2col-patches @ W + b),
#           tiled over im2col rows so the DMA pipelines against the MXU.
# ----------------------------------------------------------------------------
def _patch_embed_kernel(xp_ref, w_ref, b_ref, o_ref):
    o_ref[...] = _mxu(xp_ref[...], w_ref[...]) + b_ref[...]


def patch_embed(x_nchw, w_conv_bf16, b_conv, patch):
    B, C, H, W = x_nchw.shape
    D = w_conv_bf16.shape[0]
    gh, gw = H // patch, W // patch
    M = B * gh * gw
    K = C * patch * patch

    # Exact im2col for a non-overlapping conv: (B*P, C*p*p), row-major patches.
    xp = x_nchw.reshape(B, C, gh, patch, gw, patch)
    xp = xp.transpose(0, 2, 4, 1, 3, 5).reshape(M, K).astype(jnp.bfloat16)
    w = w_conv_bf16.reshape(D, K).T                      # (K, D), k = c*p*p + kh*p + kw

    tm = min(256, _round_up(M, 8))                       # row tile
    Mp = _round_up(M, tm)
    if Mp != M:
        xp = jnp.pad(xp, ((0, Mp - M), (0, 0)))

    out = pl.pallas_call(
        _patch_embed_kernel,
        grid=(Mp // tm,),
        in_specs=[pl.BlockSpec((tm, K), lambda i: (i, 0)),
                  pl.BlockSpec((K, D), lambda i: (0, 0)),
                  pl.BlockSpec((1, D), lambda i: (0, 0))],
        out_specs=pl.BlockSpec((tm, D), lambda i: (i, 0)),
        out_shape=jax.ShapeDtypeStruct((Mp, D), jnp.float32),
        compiler_params=pltpu.CompilerParams(
            dimension_semantics=("parallel",),
            vmem_limit_bytes=VMEM_LIMIT),
    )(xp, w, b_conv)
    return out[:M].reshape(B, gh * gw, D)


# ----------------------------------------------------------------------------
# Kernel 2: one full transformer block (pre-LN attention + pre-LN MLP),
#           fused with the final LayerNorm used for the intermediate outputs.
#           Tokens are padded to Np (multiple of 8); padded keys are masked.
# ----------------------------------------------------------------------------
def _block_kernel(x_ref, ln1w_ref, ln1b_ref, wqkv_ref, wproj_ref, bproj_ref,
                  ln2w_ref, ln2b_ref, wfc1_ref, bfc1_ref, wfc2_ref, bfc2_ref,
                  fnw_ref, fnb_ref, xout_ref, norm_ref, ctx_ref, *,
                  num_heads, n_valid, eps):
    x = x_ref[...]                                  # (Np, D) f32, current batch element
    Np, D = x.shape
    hd = D // num_heads
    scale = float(hd) ** -0.5

    # Additive key-padding mask (padded key columns -> -inf before softmax).
    key_idx = jax.lax.broadcasted_iota(jnp.int32, (1, Np), 1)
    key_bias = jnp.where(key_idx < n_valid, 0.0, -1e30).astype(jnp.float32)

    # ---- attention branch ---------------------------------------------------
    h = _layernorm(x, ln1w_ref[...], ln1b_ref[...], eps)
    qkv = _mxu(h, wqkv_ref[...])                    # (Np, 3D) f32, qkv_bias=False

    # TODO(synk): heads are still a static Python loop; a head-batched 3-D
    # dot_general would need an in-kernel (Np,H,hd)->(H,Np,hd) relayout.
    for hi in range(num_heads):
        qh = qkv[:, 0 * D + hi * hd: 0 * D + (hi + 1) * hd]      # (Np, hd)
        kh = qkv[:, 1 * D + hi * hd: 1 * D + (hi + 1) * hd]
        vh = qkv[:, 2 * D + hi * hd: 2 * D + (hi + 1) * hd]
        logits = _mxu(qh, kh, (((1,), (1,)), ((), ()))) * scale  # (Np, Np) f32
        logits = logits + key_bias
        logits = logits - jnp.max(logits, axis=-1, keepdims=True)
        p = jnp.exp(logits)
        p = p * pl.reciprocal(jnp.sum(p, axis=-1, keepdims=True), approx=True)
        ctx_ref[:, hi * hd:(hi + 1) * hd] = _mxu(p, vh)          # (Np, hd) f32

    attn_out = _mxu(ctx_ref[...], wproj_ref[...]) + bproj_ref[...]
    x = x + attn_out

    # ---- MLP branch ----------------------------------------------------------
    h2 = _layernorm(x, ln2w_ref[...], ln2b_ref[...], eps)
    m = _mxu(h2, wfc1_ref[...]) + bfc1_ref[...]
    m = _gelu_exact(m)
    m = _mxu(m, wfc2_ref[...]) + bfc2_ref[...]
    x = x + m

    xout_ref[...] = x
    norm_ref[...] = _layernorm(x, fnw_ref[...], fnb_ref[...], eps)


def transformer_block(x, blk, final_norm_w, final_norm_b, *, num_heads, n_valid, eps=1e-6):
    B, Np, D = x.shape
    kernel = functools.partial(_block_kernel, num_heads=num_heads, n_valid=n_valid, eps=eps)

    def full_spec(arr):
        nd = arr.ndim
        return pl.BlockSpec(arr.shape, lambda b, _nd=nd: (0,) * _nd)

    weights = [blk['ln1_w'], blk['ln1_b'], blk['w_qkv'], blk['w_proj'], blk['b_proj'],
               blk['ln2_w'], blk['ln2_b'], blk['w_fc1'], blk['b_fc1'],
               blk['w_fc2'], blk['b_fc2'], final_norm_w, final_norm_b]

    tok_spec = pl.BlockSpec((None, Np, D), lambda b: (b, 0, 0))   # leading dim squeezed
    in_specs = [tok_spec] + [full_spec(w) for w in weights]
    out_specs = [pl.BlockSpec((None, Np, D), lambda b: (b, 0, 0)),
                 pl.BlockSpec((None, Np, D), lambda b: (b, 0, 0))]
    out_shape = [jax.ShapeDtypeStruct((B, Np, D), jnp.float32),
                 jax.ShapeDtypeStruct((B, Np, D), jnp.float32)]

    x_out, normed = pl.pallas_call(
        kernel,
        grid=(B,),
        in_specs=in_specs,
        out_specs=out_specs,
        out_shape=out_shape,
        scratch_shapes=[pltpu.VMEM((Np, D), jnp.float32)],        # per-head context
        compiler_params=pltpu.CompilerParams(
            dimension_semantics=("parallel",),
            vmem_limit_bytes=VMEM_LIMIT),
    )(x, *weights)
    return x_out, normed


# ----------------------------------------------------------------------------
# Full VisionTransformer forward
# ----------------------------------------------------------------------------
def vit_forward(x_nchw, params, *, num_heads, patch_size):
    B = x_nchw.shape[0]
    D = params['pos_embed'].shape[-1]

    tokens = patch_embed(x_nchw, params['patch_w'], params['patch_b'], patch_size)  # (B, P, D)
    cls = jnp.broadcast_to(params['cls_token'].astype(jnp.float32), (B, 1, D))
    x = jnp.concatenate([cls, tokens], axis=1)            # (B, P+1, D)
    # interpolate_pos_encoding: npatch == N and w == h -> returns pos_embed unchanged.
    x = x + params['pos_embed']
    # pos_drop / attn_drop / proj_drop / DropPath are identities (rate 0 / eval).

    N = x.shape[1]
    Np = _round_up(N, 8)                                   # sublane-aligned token count
    if Np != N:
        x = jnp.pad(x, ((0, 0), (0, Np - N), (0, 0)))

    # TODO(synk): cross-pallas_call prefetch (P10) of the next block's weights would
    # hide the per-layer HBM->VMEM weight DMA behind the previous layer's compute.
    intermediates = []
    for blk in params['blocks']:
        x, normed = transformer_block(x, blk, params['norm_w'], params['norm_b'],
                                      num_heads=num_heads, n_valid=N)
        intermediates.append(normed[:, :N, :])             # self.norm(x) after each block

    # final: self.norm(x[:, 1]); LayerNorm is per-token, so reuse the fused normed output.
    final = intermediates[-1][:, 1, :]
    return final, intermediates


# ----------------------------------------------------------------------------
# Deterministic parameter construction (matches the module's __init__ shapes).
# Matmul weights are stored bf16 (inference quantization); everything else f32.
# ----------------------------------------------------------------------------
def init_params(key, *, img_size, patch_size, in_chans, embed_dim, depth, mlp_ratio):
    D = embed_dim
    Hmlp = int(D * mlp_ratio)
    num_patches = (img_size // patch_size) ** 2
    keys = iter(jax.random.split(key, 3 + 4 * depth))

    def tn(k, shape, std=0.02, dtype=jnp.float32):
        return (std * jax.random.truncated_normal(k, -2.0, 2.0, shape)).astype(dtype)

    params = dict(
        patch_w=tn(next(keys), (D, in_chans, patch_size, patch_size), dtype=jnp.bfloat16),
        patch_b=jnp.zeros((1, D), jnp.float32),
        cls_token=tn(next(keys), (1, 1, D)),
        pos_embed=tn(next(keys), (1, num_patches + 1, D)),
        norm_w=jnp.ones((1, D), jnp.float32),
        norm_b=jnp.zeros((1, D), jnp.float32),
        blocks=[],
    )
    for _ in range(depth):
        params['blocks'].append(dict(
            ln1_w=jnp.ones((1, D), jnp.float32), ln1_b=jnp.zeros((1, D), jnp.float32),
            w_qkv=tn(next(keys), (D, 3 * D), dtype=jnp.bfloat16),     # qkv_bias=False
            w_proj=tn(next(keys), (D, D), dtype=jnp.bfloat16),
            b_proj=jnp.zeros((1, D), jnp.float32),
            ln2_w=jnp.ones((1, D), jnp.float32), ln2_b=jnp.zeros((1, D), jnp.float32),
            w_fc1=tn(next(keys), (D, Hmlp), dtype=jnp.bfloat16),
            b_fc1=jnp.zeros((1, Hmlp), jnp.float32),
            w_fc2=tn(next(keys), (Hmlp, D), dtype=jnp.bfloat16),
            b_fc2=jnp.zeros((1, D), jnp.float32),
        ))
    return params


# ----------------------------------------------------------------------------
if __name__ == "__main__":
    cfg = dict(img_size=16, patch_size=8, in_chans=3, embed_dim=32,
               depth=2, num_heads=4, mlp_ratio=4.0)

    key = jax.random.PRNGKey(0)
    kx, kp = jax.random.split(key)
    x = jax.random.normal(kx, (2, cfg['in_chans'], cfg['img_size'], cfg['img_size']),
                          dtype=jnp.float32)
    params = init_params(kp, img_size=cfg['img_size'], patch_size=cfg['patch_size'],
                         in_chans=cfg['in_chans'], embed_dim=cfg['embed_dim'],
                         depth=cfg['depth'], mlp_ratio=cfg['mlp_ratio'])

    final, intermediates = vit_forward(x, params, num_heads=cfg['num_heads'],
                                       patch_size=cfg['patch_size'])
    jax.block_until_ready(final)
    for t in intermediates:
        jax.block_until_ready(t)

    n_tokens = (cfg['img_size'] // cfg['patch_size']) ** 2 + 1
    assert final.shape == (2, cfg['embed_dim'])
    assert len(intermediates) == cfg['depth']
    assert all(t.shape == (2, n_tokens, cfg['embed_dim']) for t in intermediates)
    assert jnp.all(jnp.isfinite(final)) and jnp.all(jnp.isfinite(intermediates[0]))
    print("KERNEL_OK")
</pallas_src>

<mosaic_0001>
module attributes {stable_mosaic.version = 11 : i64} {
  func.func @_patch_embed_kernel(%arg0: i32, %arg1: memref<8x192xbf16, #tpu.memory_space<vmem>>, %arg2: memref<192x32xbf16, #tpu.memory_space<vmem>>, %arg3: memref<1x32xf32, #tpu.memory_space<vmem>>, %arg4: memref<8x32xf32, #tpu.memory_space<vmem>>) attributes {dimension_semantics = [#tpu.dimension_semantics<parallel>], iteration_bounds = array<i64: 1>, scalar_prefetch = 0 : i64, scratch_operands = 0 : i64, tpu.core_type = #tpu.core_type<tc>, window_params = [{transform_indices = @transform_0, window_bounds = array<i64: 8, 192>}, {pipeline_mode = #tpu.pipeline_mode<synchronous>, transform_indices = @transform_1, window_bounds = array<i64: 192, 32>}, {pipeline_mode = #tpu.pipeline_mode<synchronous>, transform_indices = @transform_2, window_bounds = array<i64: 1, 32>}, {transform_indices = @transform_3, window_bounds = array<i64: 8, 32>}]} {
    %c0 = arith.constant 0 : index
    %c0_0 = arith.constant 0 : index
    %0 = vector.load %arg1[%c0, %c0_0] : memref<8x192xbf16, #tpu.memory_space<vmem>>, vector<8x192xbf16>
    %c0_1 = arith.constant 0 : index
    %c0_2 = arith.constant 0 : index
    %1 = vector.load %arg2[%c0_1, %c0_2] : memref<192x32xbf16, #tpu.memory_space<vmem>>, vector<192x32xbf16>
    %cst = arith.constant dense<0.000000e+00> : vector<8x32xf32>
    %2 = tpu.matmul %0, %1, %cst {dimension_numbers = #tpu.dot_dimension_numbers<[1], [0], [0], [1], [0, 0, 1, 1], [], []>} : vector<8x192xbf16>, vector<192x32xbf16>, vector<8x32xf32> -> vector<8x32xf32>
    %c0_3 = arith.constant 0 : index
    %c0_4 = arith.constant 0 : index
    %3 = vector.load %arg3[%c0_3, %c0_4] : memref<1x32xf32, #tpu.memory_space<vmem>>, vector<1x32xf32>
    %4 = vector.broadcast %3 : vector<1x32xf32> to vector<8x32xf32>
    %5 = arith.addf %2, %4 : vector<8x32xf32>
    %c0_5 = arith.constant 0 : index
    %c0_6 = arith.constant 0 : index
    %6 = vector.load %arg4[%c0_5, %c0_6] : memref<8x32xf32, #tpu.memory_space<vmem>>, vector<8x32xf32>
    tpu.vector_store %arg4[%c0_5, %c0_6], %5 {strides = array<i32>} : memref<8x32xf32, #tpu.memory_space<vmem>>, vector<8x32xf32>,
    return
  }
  func.func @transform_0(%arg0: i32) -> (i32, i32) {
    %c0_i32 = arith.constant 0 : i32
    %c0_i32_0 = arith.constant 0 : i32
    return %arg0, %c0_i32 : i32, i32
  }
  func.func @transform_1(%arg0: i32) -> (i32, i32) {
    %c0_i32 = arith.constant 0 : i32
    %c0_i32_0 = arith.constant 0 : i32
    %c0_i32_1 = arith.constant 0 : i32
    return %c0_i32, %c0_i32_0 : i32, i32
  }
  func.func @transform_2(%arg0: i32) -> (i32, i32) {
    %c0_i32 = arith.constant 0 : i32
    %c0_i32_0 = arith.constant 0 : i32
    %c0_i32_1 = arith.constant 0 : i32
    return %c0_i32, %c0_i32_0 : i32, i32
  }
  func.func @transform_3(%arg0: i32) -> (i32, i32) {
    %c0_i32 = arith.constant 0 : i32
    %c0_i32_0 = arith.constant 0 : i32
    return %arg0, %c0_i32 : i32, i32
  }
}

</mosaic_0001>

<bundles_post_ra>
// kernel: tpu_custom_call.1
= control target key start
LH: loop header
LB: loop body
LE: loop exit
PB: predicated region body
PF: predicated region fallthrough
CT: control target
= control target key end

     0   :  { %8 = vsyncpa [#allocation3], 0  ;;  %s431_s0 = inlined_call_operand.hbm [shape: bf16[8,192], index: 0, kind: input, shape index: {}]   ;;  %s432_s1 = inlined_call_operand.hbm [shape: bf16[192,32], index: 1, kind: input, shape index: {}]   ;;  %s433_s2 = inlined_call_operand.hbm [shape: f32[1,32], index: 2, kind: input, shape index: {}]   ;;  %s434_s3 = inlined_call_operand.hbm [shape: f32[8,32], index: 3, kind: output, shape index: {}]  }
   0x1   :  { %9 = vsyncpa [#allocation6], 0 }
   0x2   :  { %10 = vsyncpa [#allocation4], 0  ;;  %s356_s12 = smov [#allocation5]   ;;  %s262_s16 = scalar_lea.hbm %s432_s1, 1536 }
   0x3   :  { %s26_s13 = sshll.u32 %s356_s12, 4  ;;  %p263_p0 = scmp.ne.s32.totalorder %s432_s1, %s262_s16  ;;  %s27_s13 = int_to_ptr.vmem [resolvable:$true] %s26_s13 }
   0x4   :  { %p266_p1 = scmp.lt.u32.totalorder %s262_s16, %s432_s1 }
   0x6   :  { %p268_p2 = pnand %p266_p1, %p263_p0 }
   0x8   :  { %271 = shalt.err (!%p268_p2)
}
   0x9   :  { %s272_s21 = scalar_lea.vmem %s27_s13, 1536  ;;  %p277_p4 = scmp.lt.s32.totalorder %s27_s13, %s27_s13 }
   0xa   :  { %p273_p3 = scmp.ne.s32.totalorder %s27_s13, %s272_s21  ;;  %p278_p5 = scmp.lt.s32.totalorder %s272_s21, %s272_s21 }
   0xc   :  { %p279_p6 = por %p278_p5, %p277_p4 }
   0xe   :  { %p280_p7 = pnand %p279_p6, %p273_p3 }
  0x10   :  { %283 = shalt.err (!%p280_p7)
}
  0x11   :  { %s357_s22 = smov 64   ;;  %s358_s23 = smov 4  }
  0x12   :  { %32 = dma.hbm_to_vmem [thread:$0]  %s432_s1, 1536, %s27_s13, [#allocation6], %s357_s22, %s357_s22, %s358_s23  }
  0x13   :  { %s359_s26 = smov [#allocation2]   ;;  %s360_s28 = smov [#allocation7]  }
  0x14   :  { %s17_s27 = sshll.u32 %s359_s26, 4  ;;  %s39_s29 = sshll.u32 %s360_s28, 4  ;;  %s18_s27 = int_to_ptr.vmem [resolvable:$true] %s17_s27  ;;  %s40_s29 = int_to_ptr.vmem [resolvable:$true] %s39_s29 }
  0x15   :  { %s284_s5 = scalar_lea.hbm %s431_s0, 128 }
  0x16   :  { %p285_p8 = scmp.ne.s32.totalorder %s431_s0, %s284_s5  ;;  %p288_p9 = scmp.lt.u32.totalorder %s284_s5, %s431_s0 }
  0x18   :  { %p290_p10 = pnand %p288_p9, %p285_p8 }
  0x1a   :  { %293 = shalt.err (!%p290_p10)
}
  0x1b   :  { %s294_s1 = scalar_lea.vmem %s18_s27, 128  ;;  %p299_p12 = scmp.lt.s32.totalorder %s18_s27, %s18_s27 }
  0x1c   :  { %p295_p11 = scmp.ne.s32.totalorder %s18_s27, %s294_s1  ;;  %p300_p13 = scmp.lt.s32.totalorder %s294_s1, %s294_s1 }
  0x1e   :  { %p301_p0 = por %p300_p13, %p299_p12 }
  0x20   :  { %p302_p1 = pnand %p301_p0, %p295_p11 }
  0x22   :  { %305 = shalt.err (!%p302_p1)
}
  0x23   :  { %20 = dma.hbm_to_vmem [thread:$0]  %s431_s0, 128, %s18_s27, [#allocation3]  }
  0x24   :  { %s306_s14 = scalar_lea.hbm %s433_s2, 16 }
  0x25   :  { %p307_p2 = scmp.ne.s32.totalorder %s433_s2, %s306_s14  ;;  %p310_p3 = scmp.lt.u32.totalorder %s306_s14, %s433_s2 }
  0x27   :  { %p312_p4 = pnand %p310_p3, %p307_p2 }
  0x29   :  { %315 = shalt.err (!%p312_p4)
}
  0x2a   :  { %s316_s19 = scalar_lea.vmem %s40_s29, 16  ;;  %s320_s20 = scalar_lea.vmem %s40_s29, 32 }
  0x2b   :  { %p317_p5 = scmp.ne.s32.totalorder %s40_s29, %s316_s19  ;;  %p321_p6 = scmp.lt.s32.totalorder %s40_s29, %s40_s29 }
  0x2c   :  { %p322_p7 = scmp.lt.s32.totalorder %s320_s20, %s316_s19 }
  0x2e   :  { %p323_p8 = por %p322_p7, %p321_p6 }
  0x30   :  { %p324_p9 = pnand %p323_p8, %p317_p5 }
  0x32   :  { %327 = shalt.err (!%p324_p9)
}
  0x33   :  { %42 = dma.hbm_to_vmem [thread:$0]  %s433_s2, 16, %s40_s29, [#allocation6]  }
  0x34   :  { %350 = dma.done.wait [#allocation3], 128  }
  0x35   :  { %351 = vsyncadd [#allocation3], 4294967168 }
  0x36   :  { %352 = dma.done.wait [#allocation6], 1552  }
  0x37   :  { %353 = vsyncadd [#allocation6], 4294965744  ;;  %v361_v0 = vmov 0   ;;  %v248_v1 = vld [vmem:[#allocation5] sm:$0xff]   ;;  %v249_v2 = vld [vmem:[#allocation5 + $0x8] sm:$0xff]   ;;  %vm163_vm0 = vcmask 523264  }
  0x38   :  { %167 = vmatprep.subr.bf16.mxu0 %v361_v0  ;;  %v250_v3 = vld [vmem:[#allocation5 + $0x10] sm:$0xff]   ;;  %v251_v4 = vld [vmem:[#allocation5 + $0x18] sm:$0xff]   ;;  %v252_v7 = vld [vmem:[#allocation5 + $0x20] sm:$0xff]   ;;  %s362_s2 = smov [#allocation8]   ;;  %vm207_vm1 = vcmask 261120  }
  0x39   :  { %168 = vmatpush1.bf16.msra.mxu0 %v248_v1  ;;  %v53_v5 = vld [vmem:[#allocation2] sm:$0xff]  ;;  %v253_v8 = vld [vmem:[#allocation5 + $0x28] sm:$0xff]   ;;  %v254_v9 = vld [vmem:[#allocation5 + $0x30] sm:$0xff]   ;;  %s215_s22 = sshll.u32 %s362_s2, 4  ;;  %s216_s22 = int_to_ptr.vmem [resolvable:$true] %s215_s22 }
  0x3a   :  { %169 = vmatprep.subr.bf16.mxu0 %v361_v0  ;;  %v227_v6 = vcombine.high %v53_v5, %v53_v5  ;;  %v255_v10 = vld [vmem:[#allocation5 + $0x38] sm:$0xff]   ;;  %v256_v11 = vld [vmem:[#allocation5 + $0x40] sm:$0xff]   ;;  %v257_v12 = vld [vmem:[#allocation5 + $0x48] sm:$0xff]   ;;  %v226_v15 = vcombine.low %v53_v5, %v53_v5  ;;  %s328_s23 = scalar_lea.vmem %s216_s22, 128  ;;  %p333_p11 = scmp.lt.s32.totalorder %s216_s22, %s216_s22 }
  0x3b   :  { %v258_v13 = vld [vmem:[#allocation5 + $0x50] sm:$0xff]   ;;  %v259_v14 = vld [vmem:[#allocation5 + $0x58] sm:$0xff]   ;;  %v225_v16 = vld [vmem:[#allocation7] ss:$0 sm:$0xff]  ;;  %p329_p10 = scmp.ne.s32.totalorder %s216_s22, %s328_s23  ;;  %p334_p12 = scmp.lt.s32.totalorder %s328_s23, %s328_s23 }
  0x3c   :  { %240 = vmatprep.mubr.msk.bf16.mxu0 %vm163_vm0, %v227_v6 }
  0x3d   :  { %170 = vmatpush1.bf16.msra.mxu0 %v249_v2  ;;  %p335_p13 = por %p334_p12, %p333_p11 }
  0x3e   :  { %171 = vmatprep.subr.bf16.mxu0 %v361_v0 }
  0x3f   :  { %p336_p0 = pnand %p335_p13, %p329_p10 }
  0x41   :  { %172 = vmatpush1.bf16.msra.mxu0 %v250_v3 }
  0x42   :  { %173 = vmatprep.subr.bf16.mxu0 %v361_v0 }
  0x45   :  { %174 = vmatpush1.bf16.msra.mxu0 %v251_v4 }
  0x46   :  { %175 = vmatprep.subr.bf16.mxu0 %v361_v0 }
  0x49   :  { %176 = vmatpush1.bf16.msra.mxu0 %v252_v7 }
  0x4a   :  { %177 = vmatprep.subr.bf16.mxu0 %v361_v0 }
  0x4d   :  { %178 = vmatpush1.bf16.msra.mxu0 %v253_v8 }
  0x4e   :  { %179 = vmatprep.subr.bf16.mxu0 %v361_v0 }
  0x51   :  { %180 = vmatpush1.bf16.msra.mxu0 %v254_v9 }
  0x52   :  { %181 = vmatprep.subr.bf16.mxu0 %v361_v0 }
  0x55   :  { %182 = vmatpush1.bf16.msra.mxu0 %v255_v10 }
  0x56   :  { %183 = vmatprep.subr.bf16.mxu0 %v361_v0 }
  0x59   :  { %184 = vmatpush1.bf16.msra.mxu0 %v256_v11 }
  0x5a   :  { %185 = vmatprep.subr.bf16.mxu0 %v361_v0 }
  0x5d   :  { %186 = vmatpush1.bf16.msra.mxu0 %v257_v12 }
  0x5e   :  { %187 = vmatprep.subr.bf16.mxu0 %v361_v0 }
  0x61   :  { %188 = vmatpush1.bf16.msra.mxu0 %v258_v13 }
  0x62   :  { %189 = vmatprep.subr.bf16.mxu0 %v361_v0 }
  0x65   :  { %190 = vmatpush1.bf16.msra.mxu0 %v259_v14 }
  0x68   :  { %200 = vmatmul.mubr.bf16.vlgmr.msra.gmra.mrb[0].mxu0 %v226_v15 }
 0x13b   :  { %v201_v17 = vpop.f32.mrb[0].mxu0 }
 0x13c   :  { %v202_v18 = vadd.f32 %v225_v16, %v201_v17  ;;  %v203_v19 = vpop.f32.mrb[1].mxu0 }
 0x13d   :  { %v204_v20 = vpop.f32.mrb[2].mxu0 }
 0x13e   :  { %v205_v21 = vpop.f32.mrb[3].mxu0  ;;  %208 = vst.msk [vmem:[#allocation8] sm:$0xff] %vm207_vm1, %v202_v18 }
 0x13f   :  { %339 = shalt.err (!%p336_p0)
}
 0x140   :  { %s340_s26 = scalar_lea.hbm %s434_s3, 128 }
 0x141   :  { %p341_p1 = scmp.ne.s32.totalorder %s434_s3, %s340_s26  ;;  %p344_p2 = scmp.lt.u32.totalorder %s340_s26, %s434_s3 }
 0x143   :  { %p346_p3 = pnand %p344_p2, %p341_p1 }
 0x145   :  { %349 = shalt.err (!%p346_p3)
}
 0x146   :  { %218 = dma.vmem_to_hbm [thread:$0]  %s216_s22, 128, %s434_s3, [#allocation4]  }
 0x147   :  { %354 = dma.done.wait [#allocation4], 128  }
 0x148   :  { %355 = vsyncadd [#allocation4], 4294967168 }
 0x149   :  { %222 = vsyncpa [#allocation3], 1 }
 0x14a   :  { %223 = vsyncpa [#allocation6], 1 }
 0x14b   :  { %224 = vsyncpa [#allocation4], 1 }

</bundles_post_ra>
